<compile_context>
chip_gen: v7x
topology: tpu7x:2x2x1
jax: 0.10.0
libtpu: 0.0.40
codegen_flags: <defaults>
</compile_context>

<pallas_src>
import jax
import jax.numpy as jnp
from jax.experimental import pallas as pl
from jax.experimental.pallas import tpu as pltpu

INPUT_SIZE = 4
HID1 = 16
HID2 = 12
OUTPUT_SIZE = 3

_LANE = 128                     # TPU lane width; batch tiles are multiples of this.
_MAX_TB = 64 * 1024             # lanes per grid step -> ~18 MiB/step incl. buffers
_VMEM_LIMIT = 40 * 1024 * 1024  # > v5e 16 MiB default, < v7x 64 MiB physical


def _round_up(n, m):
    return ((n + m - 1) // m) * m


def _mlp_kernel(x_ref, w1_ref, b1_ref, w2_ref, b2_ref, w3_ref, b3_ref, o_ref):
    """Whole MLP on one lane-dense batch tile (batch lives on the lane axis).

    Weights stay in PyTorch (out, in) layout, biases are (out, 1) so they
    broadcast across lanes:
        x  : (4,  TB)    h1 : (16, TB)
        h2 : (12, TB)    y  : (3,  TB)
    The three dots go to the MXU; at these shapes the pipeline is HBM-bound,
    so MXU under-utilization is irrelevant.  (If a bundle dump ever shows the
    extended/MXU slot binding, the K=4/16/12 contractions can be unrolled into
    VPU broadcast-mul-adds instead — optional micro-opt, not the bottleneck.)
    """
    x = x_ref[...]
    h1 = jnp.dot(w1_ref[...], x, preferred_element_type=jnp.float32) + b1_ref[...]
    h1 = jnp.maximum(h1, 0.0)
    h2 = jnp.dot(w2_ref[...], h1, preferred_element_type=jnp.float32) + b2_ref[...]
    h2 = jnp.maximum(h2, 0.0)
    y = jnp.dot(w3_ref[...], h2, preferred_element_type=jnp.float32) + b3_ref[...]
    o_ref[...] = y.astype(o_ref.dtype)


def _choose_tiling(batch, *, max_tb=_MAX_TB):
    """Pick (tb, nb): batch-tile width (lanes) and grid size, derived from B.

    * tb is always a multiple of 128 and <= max_tb, so each step's VMEM
      footprint (~288 B * tb incl. double-buffered in/out + h1/h2 temporaries)
      stays <= ~18 MiB — safe even on v7x's 64 MiB/TC VMEM.
    * nb is the fewest steps under that cap, rounded up to an even count when
      there are >= 2 lane tiles so the "parallel" axis shards across both v7x
      TensorCores.
    * tb is re-derived from ceil(lanes / nb), so zero-padding waste is bounded
      by ~127 samples per step instead of up to tb - 1.
    """
    max_tb = max(_round_up(max_tb, _LANE), _LANE)
    lanes = _round_up(max(batch, 1), _LANE)
    nb = pl.cdiv(lanes, max_tb)
    if lanes >= 2 * _LANE and nb % 2:
        nb += 1                              # v7x: let both TensorCores work
    tb = _round_up(pl.cdiv(lanes, nb), _LANE)
    nb = pl.cdiv(lanes, tb)                  # == cdiv(batch, tb); no fully-OOB steps
    return tb, nb


def ann_two_hid_forward_fm(x_fm, params, *, max_tb=_MAX_TB):
    """Fast path.  x_fm: (4, B) float32 stored feature-major (batch on lanes).

    Returns (3, B) float32 logits, feature-major.  No relayout and no padding
    copy anywhere: ragged batches rely on Pallas' partial boundary block
    (garbage lanes flow through the element-wise-per-lane math but are never
    written back).
    """
    assert x_fm.shape[0] == INPUT_SIZE, x_fm.shape
    batch = x_fm.shape[1]
    tb, nb = _choose_tiling(batch, max_tb=max_tb)

    w1, b1 = params["w1"], params["b1"]
    w2, b2 = params["w2"], params["b2"]
    w3, b3 = params["w3"], params["b3"]

    resident = lambda i: (0, 0)   # weights/biases stay VMEM-resident across steps

    return pl.pallas_call(
        _mlp_kernel,
        out_shape=jax.ShapeDtypeStruct((OUTPUT_SIZE, batch), jnp.float32),
        grid=(nb,),
        in_specs=[
            pl.BlockSpec((INPUT_SIZE, tb), lambda i: (0, i)),
            pl.BlockSpec(w1.shape, resident), pl.BlockSpec(b1.shape, resident),
            pl.BlockSpec(w2.shape, resident), pl.BlockSpec(b2.shape, resident),
            pl.BlockSpec(w3.shape, resident), pl.BlockSpec(b3.shape, resident),
        ],
        out_specs=pl.BlockSpec((OUTPUT_SIZE, tb), lambda i: (0, i)),
        compiler_params=pltpu.CompilerParams(
            dimension_semantics=("parallel",),
            vmem_limit_bytes=_VMEM_LIMIT,
        ),
    )(x_fm, w1, b1, w2, b2, w3, b3)


def ann_two_hid_forward(x, params, *, min_pallas_batch=16384, max_tb=_MAX_TB):
    """(B, 4) -> (B, 3), matching AnnTwoHid.forward exactly.

    Small batches stay on fused XLA (~600 flops/sample cannot amortize a kernel
    launch).  Large batches transpose at the boundary and call the
    feature-major Pallas path.  NOTE: the two boundary transposes are separate
    XLA relayout passes over x and y — callers that can store activations
    feature-major should call `ann_two_hid_forward_fm` directly and skip them.
    """
    if x.shape[0] < min_pallas_batch:
        return _reference(x, params)
    return ann_two_hid_forward_fm(x.T, params, max_tb=max_tb).T


def init_params(key):
    """Deterministic init matching nn.Linear: weights in (out, in) layout,
    biases as (out, 1) so they broadcast across the lane/batch axis."""
    ks = jax.random.split(key, 6)

    def linear(kw, kb, fan_in, fan_out):
        bound = 1.0 / jnp.sqrt(fan_in)
        w = jax.random.uniform(kw, (fan_out, fan_in), jnp.float32, -bound, bound)
        b = jax.random.uniform(kb, (fan_out, 1), jnp.float32, -bound, bound)
        return w, b

    w1, b1 = linear(ks[0], ks[1], INPUT_SIZE, HID1)
    w2, b2 = linear(ks[2], ks[3], HID1, HID2)
    w3, b3 = linear(ks[4], ks[5], HID2, OUTPUT_SIZE)
    return {"w1": w1, "b1": b1, "w2": w2, "b2": b2, "w3": w3, "b3": b3}


def _reference(x, p):
    """Pure-XLA reference, sample-major (B, 4) -> (B, 3)."""
    h1 = jnp.maximum(x @ p["w1"].T + p["b1"].T, 0.0)
    h2 = jnp.maximum(h1 @ p["w2"].T + p["b2"].T, 0.0)
    return h2 @ p["w3"].T + p["b3"].T


if __name__ == "__main__":
    key = jax.random.PRNGKey(0)
    kx, kx2, kp = jax.random.split(key, 3)
    params = init_params(kp)

    # Small batch (module-scale test): grid=(1,), one partial lane tile
    # (8 of 128 lanes in-bounds).
    batch = 8
    x = jax.random.normal(kx, (batch, INPUT_SIZE), jnp.float32)
    y_ref = _reference(x, params)

    # Feature-major fast path (no relayouts around the kernel).
    y_fm = jax.block_until_ready(ann_two_hid_forward_fm(x.T, params))
    assert y_fm.shape == (OUTPUT_SIZE, batch)
    assert jnp.allclose(y_fm.T, y_ref, atol=1e-5, rtol=1e-5)

    # Module-compatible (B, 4) -> (B, 3) path, forced through the kernel.
    y = jax.block_until_ready(ann_two_hid_forward(x, params, min_pallas_batch=0))
    assert y.shape == (batch, OUTPUT_SIZE)
    assert jnp.allclose(y, y_ref, atol=1e-5, rtol=1e-5)

    # Ragged batch exercising a multi-step grid + partial tail tile:
    # max_tb=128 -> 3 steps of 128 lanes, last one with 44 lanes in-bounds.
    batch2 = 300
    x2 = jax.random.normal(kx2, (batch2, INPUT_SIZE), jnp.float32)
    y2_fm = jax.block_until_ready(
        ann_two_hid_forward_fm(x2.T, params, max_tb=128))
    assert y2_fm.shape == (OUTPUT_SIZE, batch2)
    assert jnp.allclose(y2_fm.T, _reference(x2, params), atol=1e-5, rtol=1e-5)

    print("KERNEL_OK")
</pallas_src>

<mosaic_0001>
module attributes {stable_mosaic.version = 11 : i64} {
  func.func @_mlp_kernel(%arg0: i32, %arg1: memref<4x128xf32, #tpu.memory_space<vmem>>, %arg2: memref<16x4xf32, #tpu.memory_space<vmem>>, %arg3: memref<16x1xf32, #tpu.memory_space<vmem>>, %arg4: memref<12x16xf32, #tpu.memory_space<vmem>>, %arg5: memref<12x1xf32, #tpu.memory_space<vmem>>, %arg6: memref<3x12xf32, #tpu.memory_space<vmem>>, %arg7: memref<3x1xf32, #tpu.memory_space<vmem>>, %arg8: memref<3x128xf32, #tpu.memory_space<vmem>>) attributes {dimension_semantics = [#tpu.dimension_semantics<parallel>], iteration_bounds = array<i64: 1>, scalar_prefetch = 0 : i64, scratch_operands = 0 : i64, tpu.core_type = #tpu.core_type<tc>, window_params = [{transform_indices = @transform_0, window_bounds = array<i64: 4, 128>}, {pipeline_mode = #tpu.pipeline_mode<synchronous>, transform_indices = @transform_1, window_bounds = array<i64: 16, 4>}, {pipeline_mode = #tpu.pipeline_mode<synchronous>, transform_indices = @transform_2, window_bounds = array<i64: 16, 1>}, {pipeline_mode = #tpu.pipeline_mode<synchronous>, transform_indices = @transform_3, window_bounds = array<i64: 12, 16>}, {pipeline_mode = #tpu.pipeline_mode<synchronous>, transform_indices = @transform_4, window_bounds = array<i64: 12, 1>}, {pipeline_mode = #tpu.pipeline_mode<synchronous>, transform_indices = @transform_5, window_bounds = array<i64: 3, 12>}, {pipeline_mode = #tpu.pipeline_mode<synchronous>, transform_indices = @transform_6, window_bounds = array<i64: 3, 1>}, {transform_indices = @transform_7, window_bounds = array<i64: 3, 128>}]} {
    %c0 = arith.constant 0 : index
    %c0_0 = arith.constant 0 : index
    %0 = vector.load %arg1[%c0, %c0_0] : memref<4x128xf32, #tpu.memory_space<vmem>>, vector<4x128xf32>
    %c0_1 = arith.constant 0 : index
    %c0_2 = arith.constant 0 : index
    %1 = vector.load %arg2[%c0_1, %c0_2] : memref<16x4xf32, #tpu.memory_space<vmem>>, vector<16x4xf32>
    %cst = arith.constant dense<0.000000e+00> : vector<16x128xf32>
    %2 = tpu.matmul %1, %0, %cst {dimension_numbers = #tpu.dot_dimension_numbers<[1], [0], [0], [1], [0, 0, 1, 1], [], []>} : vector<16x4xf32>, vector<4x128xf32>, vector<16x128xf32> -> vector<16x128xf32>
    %c0_3 = arith.constant 0 : index
    %c0_4 = arith.constant 0 : index
    %3 = vector.load %arg3[%c0_3, %c0_4] : memref<16x1xf32, #tpu.memory_space<vmem>>, vector<16x1xf32>
    %4 = vector.broadcast %3 : vector<16x1xf32> to vector<16x128xf32>
    %5 = arith.addf %2, %4 : vector<16x128xf32>
    %cst_5 = arith.constant 0.000000e+00 : f32
    %6 = vector.broadcast %cst_5 : f32 to vector<16x128xf32>
    %7 = arith.maximumf %5, %6 : vector<16x128xf32>
    %c0_6 = arith.constant 0 : index
    %c0_7 = arith.constant 0 : index
    %8 = vector.load %arg4[%c0_6, %c0_7] : memref<12x16xf32, #tpu.memory_space<vmem>>, vector<12x16xf32>
    %cst_8 = arith.constant dense<0.000000e+00> : vector<12x128xf32>
    %9 = tpu.matmul %8, %7, %cst_8 {dimension_numbers = #tpu.dot_dimension_numbers<[1], [0], [0], [1], [0, 0, 1, 1], [], []>} : vector<12x16xf32>, vector<16x128xf32>, vector<12x128xf32> -> vector<12x128xf32>
    %c0_9 = arith.constant 0 : index
    %c0_10 = arith.constant 0 : index
    %10 = vector.load %arg5[%c0_9, %c0_10] : memref<12x1xf32, #tpu.memory_space<vmem>>, vector<12x1xf32>
    %11 = vector.broadcast %10 : vector<12x1xf32> to vector<12x128xf32>
    %12 = arith.addf %9, %11 : vector<12x128xf32>
    %cst_11 = arith.constant 0.000000e+00 : f32
    %13 = vector.broadcast %cst_11 : f32 to vector<12x128xf32>
    %14 = arith.maximumf %12, %13 : vector<12x128xf32>
    %c0_12 = arith.constant 0 : index
    %c0_13 = arith.constant 0 : index
    %15 = vector.load %arg6[%c0_12, %c0_13] : memref<3x12xf32, #tpu.memory_space<vmem>>, vector<3x12xf32>
    %cst_14 = arith.constant dense<0.000000e+00> : vector<3x128xf32>
    %16 = tpu.matmul %15, %14, %cst_14 {dimension_numbers = #tpu.dot_dimension_numbers<[1], [0], [0], [1], [0, 0, 1, 1], [], []>} : vector<3x12xf32>, vector<12x128xf32>, vector<3x128xf32> -> vector<3x128xf32>
    %c0_15 = arith.constant 0 : index
    %c0_16 = arith.constant 0 : index
    %17 = vector.load %arg7[%c0_15, %c0_16] : memref<3x1xf32, #tpu.memory_space<vmem>>, vector<3x1xf32>
    %18 = vector.broadcast %17 : vector<3x1xf32> to vector<3x128xf32>
    %19 = arith.addf %16, %18 : vector<3x128xf32>
    %c0_17 = arith.constant 0 : index
    %c0_18 = arith.constant 0 : index
    %20 = vector.load %arg8[%c0_17, %c0_18] : memref<3x128xf32, #tpu.memory_space<vmem>>, vector<3x128xf32>
    tpu.vector_store %arg8[%c0_17, %c0_18], %19 {strides = array<i32>} : memref<3x128xf32, #tpu.memory_space<vmem>>, vector<3x128xf32>,
    return
  }
  func.func @transform_0(%arg0: i32) -> (i32, i32) {
    %c0_i32 = arith.constant 0 : i32
    %c0_i32_0 = arith.constant 0 : i32
    return %c0_i32, %arg0 : i32, i32
  }
  func.func @transform_1(%arg0: i32) -> (i32, i32) {
    %c0_i32 = arith.constant 0 : i32
    %c0_i32_0 = arith.constant 0 : i32
    %c0_i32_1 = arith.constant 0 : i32
    return %c0_i32, %c0_i32_0 : i32, i32
  }
  func.func @transform_2(%arg0: i32) -> (i32, i32) {
    %c0_i32 = arith.constant 0 : i32
    %c0_i32_0 = arith.constant 0 : i32
    %c0_i32_1 = arith.constant 0 : i32
    return %c0_i32, %c0_i32_0 : i32, i32
  }
  func.func @transform_3(%arg0: i32) -> (i32, i32) {
    %c0_i32 = arith.constant 0 : i32
    %c0_i32_0 = arith.constant 0 : i32
    %c0_i32_1 = arith.constant 0 : i32
    return %c0_i32, %c0_i32_0 : i32, i32
  }
  func.func @transform_4(%arg0: i32) -> (i32, i32) {
    %c0_i32 = arith.constant 0 : i32
    %c0_i32_0 = arith.constant 0 : i32
    %c0_i32_1 = arith.constant 0 : i32
    return %c0_i32, %c0_i32_0 : i32, i32
  }
  func.func @transform_5(%arg0: i32) -> (i32, i32) {
    %c0_i32 = arith.constant 0 : i32
    %c0_i32_0 = arith.constant 0 : i32
    %c0_i32_1 = arith.constant 0 : i32
    return %c0_i32, %c0_i32_0 : i32, i32
  }
  func.func @transform_6(%arg0: i32) -> (i32, i32) {
    %c0_i32 = arith.constant 0 : i32
    %c0_i32_0 = arith.constant 0 : i32
    %c0_i32_1 = arith.constant 0 : i32
    return %c0_i32, %c0_i32_0 : i32, i32
  }
  func.func @transform_7(%arg0: i32) -> (i32, i32) {
    %c0_i32 = arith.constant 0 : i32
    %c0_i32_0 = arith.constant 0 : i32
    return %c0_i32, %arg0 : i32, i32
  }
}

</mosaic_0001>

<bundles_post_ra>
// kernel: tpu_custom_call.1
= control target key start
LH: loop header
LB: loop body
LE: loop exit
PB: predicated region body
PF: predicated region fallthrough
CT: control target
= control target key end

     0   :  { %vm49_vm0 = vcmask 1043456   ;;  %vm42_vm1 = vcmask 31744   ;;  %v403_v4 = vmov 0   ;;  %s499_s0 = inlined_call_operand.vmem [shape: f32[4,8], index: 0, kind: input, shape index: {}]   ;;  %s500_s1 = inlined_call_operand.vmem [shape: f32[16,4], index: 1, kind: input, shape index: {}]   ;;  %s501_s2 = inlined_call_operand.vmem [shape: f32[16,1], index: 2, kind: input, shape index: {}]   ;;  %s502_s3 = inlined_call_operand.vmem [shape: f32[12,16], index: 3, kind: input, shape index: {}]   ;;  %s503_s4 = inlined_call_operand.vmem [shape: f32[12,1], index: 4, kind: input, shape index: {}]   ;;  %s504_s5 = inlined_call_operand.vmem [shape: f32[3,12], index: 5, kind: input, shape index: {}]   ;;  %s505_s6 = inlined_call_operand.vmem [shape: f32[3,1], index: 6, kind: input, shape index: {}]   ;;  %s506_s7 = inlined_call_operand.hbm [shape: f32[3,8], index: 7, kind: output, shape index: {}]  }
   0x1   :  { %v27_v0 = vld [vmem:[%s499_s0] sm:$0xf]  ;;  %v29_v2 = vld [vmem:[%s500_s1 + $0x8] sm:$0xff]  ;;  %377 = vset.pattern.permute.xlu0 %v403_v4 }
   0x2   :  { %v28_v1 = vld [vmem:[%s500_s1] sm:$0xff]  ;;  %344 = vmatprep.subr.msk.mxu0 %vm49_vm0, %v27_v0 }
   0x3   :  { %346 = vmatprep.mubr.msk.f32.mxu0 %vm42_vm1, %v28_v1  ;;  %v30_v3 = vld [vmem:[%s501_s2] sm:$0xff]  ;;  %345 = vmatpush3.msk.msra.mxu0 %vm49_vm0, %v27_v0 }
   0x4   :  { %12 = vsyncpa [#allocation3], 0  ;;  %347 = vmatmul.mubr.msk.f32.vlgmr.msra.gmra.mrb[0].mxu0 %vm42_vm1, %v29_v2  ;;  %34 = vperm.xlu0 %377, %v30_v3   ;;  %v31_v5 = vld [vmem:[%s501_s2 + $0x8] sm:$0xff]  ;;  %v229_v6 = vld [vmem:[%s505_s6] sm:$0x7]  ;;  %vm144_vm2 = vcmask 130048  }
   0x5   :  { %378 = vset.pattern.permute.xlu1 %v403_v4  ;;  %v130_v7 = vld [vmem:[%s502_s3] sm:$0xff]  ;;  %v133_v9 = vld [vmem:[%s503_s4 + $0x8] sm:$0xf]  ;;  %v404_v20 = vmov 0.0|0.0   ;;  %vm405_vm3 = vmmov 0   ;;  %v406_v21 = vmov 0.0  }
   0x6   :  { %353 = vmatprep.mubr.msk.f32.mxu1 %vm144_vm2, %v130_v7  ;;  %v132_v8 = vld [vmem:[%s503_s4] sm:$0xff]  ;;  %v131_v19 = vld [vmem:[%s502_s3 + $0x8] sm:$0xf]  ;;  %367 = vmatprep.subr.bf16.mxu0 %v404_v20  ;;  %vm407_vm4 = vmmov 1   ;;  %vm235_vm6 = vcmask 97280   ;;  %s408_s17 = smov [#allocation2]  }
   0x7   :  { %136 = vperm.xlu1 %378, %v132_v8   ;;  %360 = vmatprep.mubr.msk.f32.mxu0 %vm405_vm3, %v406_v21  ;;  %vm369_vm5 = vmpackc.low %vm49_vm0, %vm407_vm4  ;;  %v228_v31 = vld [vmem:[%s504_s5] sm:$0x7]  ;;  %s319_s18 = sshll.u32 %s408_s17, 4  ;;  %s320_s18 = int_to_ptr.vmem [resolvable:$true] %s319_s18 }
   0x8   :  { %39 = vperm.xlu0 %377, %v31_v5   ;;  %s379_s19 = scalar_lea.vmem %s320_s18, 64  ;;  %p384_p1 = scmp.lt.s32.totalorder %s320_s18, %s320_s18 }
   0x9   :  { %p380_p0 = scmp.ne.s32.totalorder %s320_s18, %s379_s19  ;;  %p385_p2 = scmp.lt.s32.totalorder %s379_s19, %s379_s19 }
   0xb   :  { %141 = vperm.xlu1 %378, %v133_v9   ;;  %p386_p3 = por %p385_p2, %p384_p1 }
   0xc   :  { %232 = vperm.xlu0 %377, %v229_v6  }
   0xd   :  { %p387_p4 = pnand %p386_p3, %p380_p0 }
  0x83   :  { %v35_v10 = vpop.permute.xlu0 %34 }
  0x86   :  { %v137_v22 = vpop.permute.xlu1 %136 }
  0x87   :  { %v40_v11 = vpop.permute.xlu0 %39 }
  0x8a   :  { %v142_v23 = vpop.permute.xlu1 %141 }
  0x8b   :  { %v233_v32 = vpop.permute.xlu0 %232 }
  0xd7   :  { %v348_v12 = vpop.f32.mrb[0].mxu0 }
  0xd8   :  { %v125_v13 = vadd.f32 %v348_v12, %v40_v11  ;;  %v119_v14 = vpop.f32.mrb[1].mxu0 }
  0xd9   :  { %v120_v15 = vadd.f32 %v119_v14, %v35_v10 }
  0xda   :  { %v129_v16 = vmax.f32 %v125_v13, 0.0 }
  0xdb   :  { %v128_v17 = vmax.f32 %v120_v15, 0.0 }
  0xdd   :  { %v363_v18 = vpack.c.bf16 %v129_v16, %v128_v17 }
  0xdf   :  { %364 = vmatprep.subr.bf16.mxu1 %v363_v18 }
  0xe0   :  { %366 = vmatpush3.bf16.msra.mxu1 %v363_v18 }
  0xe3   :  { %354 = vmatmul.mubr.msk.f32.vlgmr.msra.gmra.mrb[0].mxu1 %vm144_vm2, %v131_v19 }
 0x1b6   :  { %v355_v24 = vpop.f32.mrb[0].mxu1 }
 0x1b7   :  { %v223_v25 = vadd.f32 %v355_v24, %v142_v23  ;;  %v217_v26 = vpop.f32.mrb[1].mxu1 }
 0x1b8   :  { %v218_v27 = vadd.f32 %v217_v26, %v137_v22 }
 0x1b9   :  { %v227_v28 = vmax.f32 %v223_v25, 0.0 }
 0x1ba   :  { %v226_v29 = vmax.f32 %v218_v27, 0.0 }
 0x1bc   :  { %v368_v30 = vpack.c.bf16 %v227_v28, %v226_v29 }
 0x1be   :  { %370 = vmatpush3.bf16.msk.msra.mxu0 %vm369_vm5, %v368_v30 }
 0x1c1   :  { %361 = vmatmul.mubr.msk.f32.vlgmr.msra.gmra.mrb[2].mxu0 %vm235_vm6, %v228_v31 }
 0x294   :  { %v308_v33 = vpop.f32.mrb[2].mxu0 }
 0x295   :  { %v309_v34 = vadd.f32 %v308_v33, %v233_v32  ;;  %v362_v35 = vpop.f32.mrb[3].mxu0 }
 0x297   :  { %312 = vst [vmem:[#allocation2] sm:$0x7] %v309_v34 }
 0x298   :  { %390 = shalt.err (!%p387_p4)
}
 0x299   :  { %s391_s5 = scalar_lea.hbm %s506_s7, 64 }
 0x29a   :  { %p392_p5 = scmp.ne.s32.totalorder %s506_s7, %s391_s5  ;;  %p395_p6 = scmp.lt.u32.totalorder %s391_s5, %s506_s7 }
 0x29c   :  { %p397_p7 = pnand %p395_p6, %p392_p5 }
 0x29e   :  { %400 = shalt.err (!%p397_p7)
}
 0x29f   :  { %322 = dma.vmem_to_hbm [thread:$0]  %s320_s18, 64, %s506_s7, [#allocation3]  }
 0x2a0   :  { %401 = dma.done.wait [#allocation3], 64  }
 0x2a1   :  { %402 = vsyncadd [#allocation3], 4294967232 }
 0x2a2   :  { %326 = vsyncpa [#allocation3], 1 }

</bundles_post_ra>
